<compile_context>
chip_gen: v5e
topology: v5e:2x2
jax: 0.10.0
libtpu: 0.0.40
codegen_flags: <defaults>
</compile_context>

<pallas_src>
import jax
import jax.numpy as jnp
from jax.experimental import pallas as pl
from jax.experimental.pallas import tpu as pltpu

LANE = 128
SUBLANE = 8


def dqn_kernel(x_ref, w1_ref, b1_ref, w2_ref, b2_ref, w3_ref, b3_ref, o_ref):
    """Fused forward: relu(x@W1+b1) -> relu(.@W2+b2) -> .@W3+b3 (f32 accumulation)."""
    x = x_ref[...]

    h1 = jnp.dot(x, w1_ref[...], preferred_element_type=jnp.float32) + b1_ref[...]
    h1 = jnp.maximum(h1, 0.0)

    h2 = (
        jnp.dot(h1.astype(w2_ref.dtype), w2_ref[...], preferred_element_type=jnp.float32)
        + b2_ref[...]
    )
    h2 = jnp.maximum(h2, 0.0)

    out = (
        jnp.dot(h2.astype(w3_ref.dtype), w3_ref[...], preferred_element_type=jnp.float32)
        + b3_ref[...]
    )
    o_ref[...] = out.astype(o_ref.dtype)


def init_dqn_params(key, input_size=11, hidden_size=128, output_size=3):
    """PyTorch nn.Linear default init (U(-1/sqrt(fan_in), +)), weights stored [in, out]."""
    ks = jax.random.split(key, 6)

    def linear(kw, kb, fan_in, fan_out):
        bound = 1.0 / jnp.sqrt(jnp.float32(fan_in))
        w = jax.random.uniform(kw, (fan_in, fan_out), jnp.float32, -bound, bound)
        b = jax.random.uniform(kb, (1, fan_out), jnp.float32, -bound, bound)
        return w, b

    w1, b1 = linear(ks[0], ks[1], input_size, hidden_size)
    w2, b2 = linear(ks[2], ks[3], hidden_size, hidden_size)
    w3, b3 = linear(ks[4], ks[5], hidden_size, output_size)
    return (w1, b1, w2, b2, w3, b3)


def prepare_params(params, weight_dtype=jnp.float32):
    """One-time prep: pad the last layer to a lane-dense (128-multiple) output width and
    optionally store weights in bf16 (biases stay f32; accumulation stays f32)."""
    w1, b1, w2, b2, w3, b3 = params
    out_size = w3.shape[1]
    out_pad = max(LANE, ((out_size + LANE - 1) // LANE) * LANE)
    w3p = jnp.pad(w3, ((0, 0), (0, out_pad - out_size)))
    b3p = jnp.pad(b3, ((0, 0), (0, out_pad - out_size)))
    w1 = w1.astype(weight_dtype)
    w2 = w2.astype(weight_dtype)
    w3p = w3p.astype(weight_dtype)
    return (w1, b1, w2, b2, w3p, b3p), out_size


def dqn_forward(x, prepared_params, out_size, *, block_b=512):
    """x: [B, input_size] float32. Returns [B, out_size] float32."""
    w1, b1, w2, b2, w3p, b3p = prepared_params
    B, in_size = x.shape
    hidden = w1.shape[1]
    out_pad = w3p.shape[1]

    # Batch tile: multiple of the f32 sublane (8), capped at block_b.
    tb = min(block_b, max(SUBLANE, ((B + SUBLANE - 1) // SUBLANE) * SUBLANE))
    b_padded = pl.cdiv(B, tb) * tb
    if b_padded != B:
        x = jnp.pad(x, ((0, b_padded - B), (0, 0)))

    resident = lambda i: (0, 0)  # weights/biases: same block every grid step
    out = pl.pallas_call(
        dqn_kernel,
        out_shape=jax.ShapeDtypeStruct((b_padded, out_pad), jnp.float32),
        grid=(b_padded // tb,),
        in_specs=[
            pl.BlockSpec((tb, in_size), lambda i: (i, 0)),        # x: batch-tiled
            pl.BlockSpec((in_size, hidden), resident),            # W1
            pl.BlockSpec((1, hidden), resident),                  # b1
            pl.BlockSpec((hidden, hidden), resident),             # W2
            pl.BlockSpec((1, hidden), resident),                  # b2
            pl.BlockSpec((hidden, out_pad), resident),            # W3 (lane-padded)
            pl.BlockSpec((1, out_pad), resident),                 # b3 (lane-padded)
        ],
        out_specs=pl.BlockSpec((tb, out_pad), lambda i: (i, 0)),  # lane-dense store
        compiler_params=pltpu.CompilerParams(
            dimension_semantics=("parallel",),                    # megacore on v7x
        ),
    )(x, w1, b1, w2, b2, w3p, b3p)

    return out[:B, :out_size]


def _ref_forward(x, params):
    w1, b1, w2, b2, w3, b3 = params
    h = jnp.maximum(x @ w1 + b1, 0.0)
    h = jnp.maximum(h @ w2 + b2, 0.0)
    return h @ w3 + b3


if __name__ == "__main__":
    key = jax.random.PRNGKey(0)
    k_params, k_x1, k_x2 = jax.random.split(key, 3)

    input_size, hidden_size, output_size = 11, 128, 3
    params = init_dqn_params(k_params, input_size, hidden_size, output_size)
    prepared, out_size = prepare_params(params, weight_dtype=jnp.float32)

    # Small-shape check (batch=2, matches the module's intended use).
    x_small = jax.random.normal(k_x1, (2, input_size), jnp.float32)
    out_small = jax.block_until_ready(dqn_forward(x_small, prepared, out_size))
    ref_small = _ref_forward(x_small, params)
    assert out_small.shape == (2, output_size)
    assert jnp.allclose(out_small, ref_small, atol=1e-4, rtol=1e-4)

    # Ragged, multi-tile check (exercises the batch grid + padding path).
    x_big = jax.random.normal(k_x2, (300, input_size), jnp.float32)
    out_big = jax.block_until_ready(dqn_forward(x_big, prepared, out_size, block_b=128))
    ref_big = _ref_forward(x_big, params)
    assert out_big.shape == (300, output_size)
    assert jnp.allclose(out_big, ref_big, atol=1e-4, rtol=1e-4)

    print("KERNEL_OK")
</pallas_src>

<mosaic_0001>
module attributes {stable_mosaic.version = 11 : i64} {
  func.func @dqn_kernel(%arg0: i32, %arg1: memref<8x11xf32, #tpu.memory_space<vmem>>, %arg2: memref<11x128xf32, #tpu.memory_space<vmem>>, %arg3: memref<1x128xf32, #tpu.memory_space<vmem>>, %arg4: memref<128x128xf32, #tpu.memory_space<vmem>>, %arg5: memref<1x128xf32, #tpu.memory_space<vmem>>, %arg6: memref<128x128xf32, #tpu.memory_space<vmem>>, %arg7: memref<1x128xf32, #tpu.memory_space<vmem>>, %arg8: memref<8x128xf32, #tpu.memory_space<vmem>>) attributes {dimension_semantics = [#tpu.dimension_semantics<parallel>], iteration_bounds = array<i64: 1>, scalar_prefetch = 0 : i64, scratch_operands = 0 : i64, tpu.core_type = #tpu.core_type<tc>, window_params = [{transform_indices = @transform_0, window_bounds = array<i64: 8, 11>}, {pipeline_mode = #tpu.pipeline_mode<synchronous>, transform_indices = @transform_1, window_bounds = array<i64: 11, 128>}, {pipeline_mode = #tpu.pipeline_mode<synchronous>, transform_indices = @transform_2, window_bounds = array<i64: 1, 128>}, {pipeline_mode = #tpu.pipeline_mode<synchronous>, transform_indices = @transform_3, window_bounds = array<i64: 128, 128>}, {pipeline_mode = #tpu.pipeline_mode<synchronous>, transform_indices = @transform_4, window_bounds = array<i64: 1, 128>}, {pipeline_mode = #tpu.pipeline_mode<synchronous>, transform_indices = @transform_5, window_bounds = array<i64: 128, 128>}, {pipeline_mode = #tpu.pipeline_mode<synchronous>, transform_indices = @transform_6, window_bounds = array<i64: 1, 128>}, {transform_indices = @transform_7, window_bounds = array<i64: 8, 128>}]} {
    %c0 = arith.constant 0 : index
    %c0_0 = arith.constant 0 : index
    %0 = vector.load %arg1[%c0, %c0_0] : memref<8x11xf32, #tpu.memory_space<vmem>>, vector<8x11xf32>
    %c0_1 = arith.constant 0 : index
    %c0_2 = arith.constant 0 : index
    %1 = vector.load %arg2[%c0_1, %c0_2] : memref<11x128xf32, #tpu.memory_space<vmem>>, vector<11x128xf32>
    %cst = arith.constant dense<0.000000e+00> : vector<8x128xf32>
    %2 = tpu.matmul %0, %1, %cst {dimension_numbers = #tpu.dot_dimension_numbers<[1], [0], [0], [1], [0, 0, 1, 1], [], []>} : vector<8x11xf32>, vector<11x128xf32>, vector<8x128xf32> -> vector<8x128xf32>
    %c0_3 = arith.constant 0 : index
    %c0_4 = arith.constant 0 : index
    %3 = vector.load %arg3[%c0_3, %c0_4] : memref<1x128xf32, #tpu.memory_space<vmem>>, vector<1x128xf32>
    %4 = vector.broadcast %3 : vector<1x128xf32> to vector<8x128xf32>
    %5 = arith.addf %2, %4 : vector<8x128xf32>
    %cst_5 = arith.constant 0.000000e+00 : f32
    %6 = vector.broadcast %cst_5 : f32 to vector<8x128xf32>
    %7 = arith.maximumf %5, %6 : vector<8x128xf32>
    %c0_6 = arith.constant 0 : index
    %c0_7 = arith.constant 0 : index
    %8 = vector.load %arg4[%c0_6, %c0_7] : memref<128x128xf32, #tpu.memory_space<vmem>>, vector<128x128xf32>
    %cst_8 = arith.constant dense<0.000000e+00> : vector<8x128xf32>
    %9 = tpu.matmul %7, %8, %cst_8 {dimension_numbers = #tpu.dot_dimension_numbers<[1], [0], [0], [1], [0, 0, 1, 1], [], []>} : vector<8x128xf32>, vector<128x128xf32>, vector<8x128xf32> -> vector<8x128xf32>
    %c0_9 = arith.constant 0 : index
    %c0_10 = arith.constant 0 : index
    %10 = vector.load %arg5[%c0_9, %c0_10] : memref<1x128xf32, #tpu.memory_space<vmem>>, vector<1x128xf32>
    %11 = vector.broadcast %10 : vector<1x128xf32> to vector<8x128xf32>
    %12 = arith.addf %9, %11 : vector<8x128xf32>
    %cst_11 = arith.constant 0.000000e+00 : f32
    %13 = vector.broadcast %cst_11 : f32 to vector<8x128xf32>
    %14 = arith.maximumf %12, %13 : vector<8x128xf32>
    %c0_12 = arith.constant 0 : index
    %c0_13 = arith.constant 0 : index
    %15 = vector.load %arg6[%c0_12, %c0_13] : memref<128x128xf32, #tpu.memory_space<vmem>>, vector<128x128xf32>
    %cst_14 = arith.constant dense<0.000000e+00> : vector<8x128xf32>
    %16 = tpu.matmul %14, %15, %cst_14 {dimension_numbers = #tpu.dot_dimension_numbers<[1], [0], [0], [1], [0, 0, 1, 1], [], []>} : vector<8x128xf32>, vector<128x128xf32>, vector<8x128xf32> -> vector<8x128xf32>
    %c0_15 = arith.constant 0 : index
    %c0_16 = arith.constant 0 : index
    %17 = vector.load %arg7[%c0_15, %c0_16] : memref<1x128xf32, #tpu.memory_space<vmem>>, vector<1x128xf32>
    %18 = vector.broadcast %17 : vector<1x128xf32> to vector<8x128xf32>
    %19 = arith.addf %16, %18 : vector<8x128xf32>
    %c0_17 = arith.constant 0 : index
    %c0_18 = arith.constant 0 : index
    %20 = vector.load %arg8[%c0_17, %c0_18] : memref<8x128xf32, #tpu.memory_space<vmem>>, vector<8x128xf32>
    tpu.vector_store %arg8[%c0_17, %c0_18], %19 {strides = array<i32>} : memref<8x128xf32, #tpu.memory_space<vmem>>, vector<8x128xf32>,
    return
  }
  func.func @transform_0(%arg0: i32) -> (i32, i32) {
    %c0_i32 = arith.constant 0 : i32
    %c0_i32_0 = arith.constant 0 : i32
    return %arg0, %c0_i32 : i32, i32
  }
  func.func @transform_1(%arg0: i32) -> (i32, i32) {
    %c0_i32 = arith.constant 0 : i32
    %c0_i32_0 = arith.constant 0 : i32
    %c0_i32_1 = arith.constant 0 : i32
    return %c0_i32, %c0_i32_0 : i32, i32
  }
  func.func @transform_2(%arg0: i32) -> (i32, i32) {
    %c0_i32 = arith.constant 0 : i32
    %c0_i32_0 = arith.constant 0 : i32
    %c0_i32_1 = arith.constant 0 : i32
    return %c0_i32, %c0_i32_0 : i32, i32
  }
  func.func @transform_3(%arg0: i32) -> (i32, i32) {
    %c0_i32 = arith.constant 0 : i32
    %c0_i32_0 = arith.constant 0 : i32
    %c0_i32_1 = arith.constant 0 : i32
    return %c0_i32, %c0_i32_0 : i32, i32
  }
  func.func @transform_4(%arg0: i32) -> (i32, i32) {
    %c0_i32 = arith.constant 0 : i32
    %c0_i32_0 = arith.constant 0 : i32
    %c0_i32_1 = arith.constant 0 : i32
    return %c0_i32, %c0_i32_0 : i32, i32
  }
  func.func @transform_5(%arg0: i32) -> (i32, i32) {
    %c0_i32 = arith.constant 0 : i32
    %c0_i32_0 = arith.constant 0 : i32
    %c0_i32_1 = arith.constant 0 : i32
    return %c0_i32, %c0_i32_0 : i32, i32
  }
  func.func @transform_6(%arg0: i32) -> (i32, i32) {
    %c0_i32 = arith.constant 0 : i32
    %c0_i32_0 = arith.constant 0 : i32
    %c0_i32_1 = arith.constant 0 : i32
    return %c0_i32, %c0_i32_0 : i32, i32
  }
  func.func @transform_7(%arg0: i32) -> (i32, i32) {
    %c0_i32 = arith.constant 0 : i32
    %c0_i32_0 = arith.constant 0 : i32
    return %arg0, %c0_i32 : i32, i32
  }
}

</mosaic_0001>

<bundles_post_ra>
// kernel: tpu_custom_call.1
= control target key start
LH: loop header
LB: loop body
LE: loop exit
PB: predicated region body
PF: predicated region fallthrough
CT: control target
= control target key end

     0   :  { %12 = vsyncpa [#allocation3], 0  ;;  %s436_s0 = inlined_call_operand.hbm [shape: f32[8,11], index: 0, kind: input, shape index: {}]   ;;  %s437_s1 = inlined_call_operand.hbm [shape: f32[11,128], index: 1, kind: input, shape index: {}]   ;;  %s438_s2 = inlined_call_operand.vmem [shape: f32[1,128], index: 2, kind: input, shape index: {}]   ;;  %s439_s3 = inlined_call_operand.hbm [shape: f32[128,128], index: 3, kind: input, shape index: {}]   ;;  %s440_s4 = inlined_call_operand.vmem [shape: f32[1,128], index: 4, kind: input, shape index: {}]   ;;  %s441_s5 = inlined_call_operand.hbm [shape: f32[128,128], index: 5, kind: input, shape index: {}]   ;;  %s442_s6 = inlined_call_operand.vmem [shape: f32[1,128], index: 6, kind: input, shape index: {}]   ;;  %s443_s7 = inlined_call_operand.hbm [shape: f32[8,128], index: 7, kind: output, shape index: {}]  }
   0x1   :  { %13 = vsyncpa [#allocation6], 0 }
   0x2   :  { %14 = vsyncpa [#allocation9], 0  ;;  %s31_s26 = sshll.u32 %s437_s1, 4  ;;  %s32_s26 = int_to_ptr.hbm [resolvable:$true] %s31_s26 }
   0x3   :  { %15 = vsyncpa [#allocation4], 0  ;;  %s365_s27 = smov [#allocation5]   ;;  %s21_s8 = sshll.u32 %s436_s0, 4  ;;  %s22_s8 = int_to_ptr.hbm [resolvable:$true] %s21_s8 }
   0x4   :  { %s33_s28 = sshll.u32 %s365_s27, 4  ;;  %s366_s9 = smov 128   ;;  %s34_s28 = int_to_ptr.vmem [resolvable:$true] %s33_s28 }
   0x5   :  { %s367_s10 = smov 8   ;;  %s368_s11 = smov [#allocation2]  }
   0x6   :  { %39 = dma.hbm_to_vmem [thread:$0]  %s32_s26, 256, %s34_s28, [#allocation6], %s366_s9, %s366_s9, %s367_s10  }
   0x7   :  { %s23_s12 = sshll.u32 %s368_s11, 4  ;;  %s46_s15 = sshll.u32 %s439_s3, 4  ;;  %s24_s12 = int_to_ptr.vmem [resolvable:$true] %s23_s12  ;;  %s47_s15 = int_to_ptr.hbm [resolvable:$true] %s46_s15 }
   0x8   :  { %26 = dma.hbm_to_vmem [thread:$0]  %s22_s8, 128, %s24_s12, [#allocation3]  }
   0x9   :  { %s61_s17 = sshll.u32 %s441_s5, 4  ;;  %s369_s18 = smov [#allocation7]   ;;  %s62_s17 = int_to_ptr.hbm [resolvable:$true] %s61_s17 }
   0xa   :  { %s48_s19 = sshll.u32 %s369_s18, 4  ;;  %s370_s0 = smov [#allocation8]   ;;  %s49_s19 = int_to_ptr.vmem [resolvable:$true] %s48_s19 }
   0xb   :  { %54 = dma.hbm_to_vmem [thread:$0]  %s47_s15, 2048, %s49_s19, [#allocation6], %s366_s9, %s366_s9, %s367_s10  }
   0xc   :  { %s63_s20 = sshll.u32 %s370_s0, 4  ;;  %s64_s20 = int_to_ptr.vmem [resolvable:$true] %s63_s20 }
   0xd   :  { %69 = dma.hbm_to_vmem [thread:$0]  %s62_s17, 2048, %s64_s20, [#allocation9], %s366_s9, %s366_s9, %s367_s10  }
   0xe   :  { %357 = dma.done.wait [#allocation3], 128  }
   0xf   :  { %358 = vsyncadd [#allocation3], 4294967168 }
  0x10   :  { %359 = dma.done.wait [#allocation6], 2304  }
  0x11   :  { %360 = vsyncadd [#allocation6], 4294964992 }
  0x12   :  { %361 = dma.done.wait [#allocation9], 2048  }
  0x13   :  { %362 = vsyncadd [#allocation9], 4294965248  ;;  %vm99_vm0 = vcmask 1042432   ;;  %v90_v0 = vld [vmem:[#allocation5 + $0x8] sm:$0x7]  ;;  %v89_v1 = vld [vmem:[#allocation5] sm:$0xff] }
  0x14   :  { %225 = vmatpush.msk.msra.mxu0 %vm99_vm0, %v90_v0  ;;  %v88_v2 = vld [vmem:[#allocation2] sm:$0xff]  ;;  %vm95_vm1 = vcmask 89088   ;;  %v139_v3 = vld [vmem:[#allocation7 + $0x78] sm:$0xff]  ;;  %v138_v4 = vld [vmem:[#allocation7 + $0x70] sm:$0xff]  ;;  %s371_s24 = smov [#allocation10]   ;;  %s213_s28 = sshll.u32 %s443_s7, 4  ;;  %s214_s28 = int_to_ptr.hbm [resolvable:$true] %s213_s28 }
  0x15   :  { %144 = vmatpush.msra.mxu1 %v139_v3  ;;  %v137_v5 = vld [vmem:[#allocation7 + $0x68] sm:$0xff]  ;;  %v136_v6 = vld [vmem:[#allocation7 + $0x60] sm:$0xff]  ;;  %v135_v7 = vld [vmem:[#allocation7 + $0x58] sm:$0xff]  ;;  %s211_s25 = sshll.u32 %s371_s24, 4  ;;  %s212_s25 = int_to_ptr.vmem [resolvable:$true] %s211_s25 }
  0x16   :  { %118 = vmatpush.msra.mxu0 %v89_v1  ;;  %v134_v8 = vld [vmem:[#allocation7 + $0x50] sm:$0xff]  ;;  %v133_v9 = vld [vmem:[#allocation7 + $0x48] sm:$0xff]  ;;  %v132_v10 = vld [vmem:[#allocation7 + $0x40] sm:$0xff] }
  0x17   :  { %226 = vmatmul.msk.f32.vlgmr.msra.gmra.mxu0 %vm95_vm1, %v88_v2  ;;  %145 = vmatpush.msra.mxu1 %v138_v4  ;;  %v131_v11 = vld [vmem:[#allocation7 + $0x38] sm:$0xff]  ;;  %v130_v12 = vld [vmem:[#allocation7 + $0x30] sm:$0xff]  ;;  %v129_v13 = vld [vmem:[#allocation7 + $0x28] sm:$0xff] }
  0x18   :  { %v128_v14 = vld [vmem:[#allocation7 + $0x20] sm:$0xff]  ;;  %v127_v15 = vld [vmem:[#allocation7 + $0x18] sm:$0xff]  ;;  %v126_v16 = vld [vmem:[#allocation7 + $0x10] sm:$0xff] }
  0x19   :  { %146 = vmatpush.msra.mxu1 %v137_v5  ;;  %v125_v17 = vld [vmem:[#allocation7 + $0x8] sm:$0xff]  ;;  %v124_v18 = vld [vmem:[#allocation7] sm:$0xff]  ;;  %v180_v19 = vld [vmem:[#allocation8 + $0x78] sm:$0xff] }
  0x1a   :  { %v179_v20 = vld [vmem:[#allocation8 + $0x70] sm:$0xff]  ;;  %185 = vmatpush.msra.mxu2 %v180_v19  ;;  %v178_v21 = vld [vmem:[#allocation8 + $0x68] sm:$0xff]  ;;  %v177_v22 = vld [vmem:[#allocation8 + $0x60] sm:$0xff] }
  0x1b   :  { %147 = vmatpush.msra.mxu1 %v136_v6  ;;  %v176_v23 = vld [vmem:[#allocation8 + $0x58] sm:$0xff]  ;;  %v175_v24 = vld [vmem:[#allocation8 + $0x50] sm:$0xff]  ;;  %v174_v25 = vld [vmem:[#allocation8 + $0x48] sm:$0xff] }
  0x1c   :  { %186 = vmatpush.msra.mxu2 %v179_v20  ;;  %v173_v26 = vld [vmem:[#allocation8 + $0x40] sm:$0xff]  ;;  %v172_v27 = vld [vmem:[#allocation8 + $0x38] sm:$0xff]  ;;  %v171_v28 = vld [vmem:[#allocation8 + $0x30] sm:$0xff] }
  0x1d   :  { %148 = vmatpush.msra.mxu1 %v135_v7  ;;  %v170_v29 = vld [vmem:[#allocation8 + $0x28] sm:$0xff]  ;;  %v169_v30 = vld [vmem:[#allocation8 + $0x20] sm:$0xff]  ;;  %v168_v31 = vld [vmem:[#allocation8 + $0x18] sm:$0xff] }
  0x1e   :  { %187 = vmatpush.msra.mxu2 %v178_v21  ;;  %v234_v32 = vld [vmem:[%s438_s2] ss:$0 sm:$0xff]  ;;  %v167_v36 = vld [vmem:[#allocation8 + $0x10] sm:$0xff]  ;;  %v165_v38 = vld [vmem:[#allocation8] sm:$0xff] }
  0x1f   :  { %149 = vmatpush.msra.mxu1 %v134_v8  ;;  %v166_v37 = vld [vmem:[#allocation8 + $0x8] sm:$0xff] }
  0x20   :  { %188 = vmatpush.msra.mxu2 %v177_v22  ;;  %v235_v39 = vld [vmem:[%s440_s4] ss:$0 sm:$0xff] }
  0x21   :  { %150 = vmatpush.msra.mxu1 %v133_v9  ;;  %v236_v43 = vld [vmem:[%s442_s6] ss:$0 sm:$0xff] }
  0x22   :  { %189 = vmatpush.msra.mxu2 %v176_v23 }
  0x23   :  { %151 = vmatpush.msra.mxu1 %v132_v10 }
  0x24   :  { %190 = vmatpush.msra.mxu2 %v175_v24 }
  0x25   :  { %152 = vmatpush.msra.mxu1 %v131_v11 }
  0x26   :  { %191 = vmatpush.msra.mxu2 %v174_v25 }
  0x27   :  { %153 = vmatpush.msra.mxu1 %v130_v12 }
  0x28   :  { %192 = vmatpush.msra.mxu2 %v173_v26 }
  0x29   :  { %154 = vmatpush.msra.mxu1 %v129_v13 }
  0x2a   :  { %193 = vmatpush.msra.mxu2 %v172_v27 }
  0x2b   :  { %155 = vmatpush.msra.mxu1 %v128_v14 }
  0x2c   :  { %194 = vmatpush.msra.mxu2 %v171_v28 }
  0x2d   :  { %156 = vmatpush.msra.mxu1 %v127_v15 }
  0x2e   :  { %195 = vmatpush.msra.mxu2 %v170_v29 }
  0x2f   :  { %157 = vmatpush.msra.mxu1 %v126_v16 }
  0x30   :  { %196 = vmatpush.msra.mxu2 %v169_v30 }
  0x31   :  { %158 = vmatpush.msra.mxu1 %v125_v17 }
  0x32   :  { %197 = vmatpush.msra.mxu2 %v168_v31 }
  0x33   :  { %159 = vmatpush.msra.mxu1 %v124_v18 }
  0x34   :  { %198 = vmatpush.msra.mxu2 %v167_v36 }
  0x36   :  { %199 = vmatpush.msra.mxu2 %v166_v37 }
  0x38   :  { %200 = vmatpush.msra.mxu2 %v165_v38 }
  0x94   :  { %v120_v33 = vpop.f32.mrf.mxu0 }
  0x95   :  { %v121_v34 = vadd.f32 %v234_v32, %v120_v33 }
  0x97   :  { %v123_v35 = vmax.f32 %v121_v34, 0.0 }
  0x99   :  { %160 = vmatmul.f32.vlgmr.msra.gmra.mxu1 %v123_v35 }
 0x116   :  { %v161_v40 = vpop.f32.mrf.mxu1 }
 0x117   :  { %v162_v41 = vadd.f32 %v235_v39, %v161_v40 }
 0x119   :  { %v164_v42 = vmax.f32 %v162_v41, 0.0 }
 0x11b   :  { %201 = vmatmul.f32.vlgmr.msra.gmra.mxu2 %v164_v42 }
 0x19e   :  { %v202_v44 = vpop.f32.mrf.mxu2 }
 0x19f   :  { %v203_v45 = vadd.f32 %v236_v43, %v202_v44 }
 0x1a1   :  { %205 = vst [vmem:[#allocation10] sm:$0xff] %v203_v45 }
 0x1a2   :  { %216 = dma.vmem_to_hbm [thread:$0]  %s212_s25, 128, %s214_s28, [#allocation4]  }
 0x1a3   :  { %363 = dma.done.wait [#allocation4], 128  }
 0x1a4   :  { %364 = vsyncadd [#allocation4], 4294967168 }
 0x1a5   :  { %221 = vsyncpa [#allocation3], 1 }
 0x1a6   :  { %222 = vsyncpa [#allocation6], 1 }
 0x1a7   :  { %223 = vsyncpa [#allocation9], 1 }
 0x1a8   :  { %224 = vsyncpa [#allocation4], 1 }

</bundles_post_ra>
